<compile_context>
chip_gen: v7x
topology: tpu7x:2x2x1
jax: 0.10.0
libtpu: 0.0.40
codegen_flags: <defaults>
</compile_context>

<pallas_src>
import math
import functools

import jax
import jax.numpy as jnp
from jax.experimental import pallas as pl
from jax.experimental.pallas import tpu as pltpu

# torchvision RoIHeads / BoxCoder defaults
BOX_CODER_WEIGHTS = (10.0, 10.0, 5.0, 5.0)
INV_WX, INV_WY, INV_WW, INV_WH = (1.0 / w for w in BOX_CODER_WEIGHTS)
BBOX_XFORM_CLIP = math.log(1000.0 / 16.0)
SCORE_THRESH = 0.05
NMS_THRESH = 0.5
DETECTIONS_PER_IMG = 16   # fixed (padded) detection budget per image
MIN_BOX_SIZE = 1e-2
NMS_TOPK = 64             # candidate cap before the greedy NMS loop


# ----------------------------------------------------------------------------
# Pallas kernel 1: box decode + clip-to-image + class softmax (lane-dense)
# ----------------------------------------------------------------------------
def _box_postprocess_kernel(shapes_ref, prop_ref, logits_ref, reg_ref,
                            boxes_ref, scores_ref):
    b = pl.program_id(0)
    img_h = shapes_ref[b, 0]
    img_w = shapes_ref[b, 1]

    props = prop_ref[0]                       # (4, TN), N on lanes
    px1 = props[0:1, :]                       # (1, TN)
    py1 = props[1:2, :]
    px2 = props[2:3, :]
    py2 = props[3:4, :]
    widths = px2 - px1
    heights = py2 - py1
    ctr_x = px1 + 0.5 * widths
    ctr_y = py1 + 0.5 * heights

    reg = reg_ref[0]                          # (4, C, TN)
    dx = reg[0] * INV_WX                      # (C, TN)
    dy = reg[1] * INV_WY
    dw = jnp.minimum(reg[2] * INV_WW, BBOX_XFORM_CLIP)
    dh = jnp.minimum(reg[3] * INV_WH, BBOX_XFORM_CLIP)

    pred_ctr_x = dx * widths + ctr_x          # (C, TN) (broadcast over sublanes)
    pred_ctr_y = dy * heights + ctr_y
    half_w = 0.5 * (jnp.exp(dw) * widths)
    half_h = 0.5 * (jnp.exp(dh) * heights)

    # clip_boxes_to_image: x -> [0, width], y -> [0, height]
    boxes_ref[0, 0] = jnp.clip(pred_ctr_x - half_w, 0.0, img_w)
    boxes_ref[0, 1] = jnp.clip(pred_ctr_y - half_h, 0.0, img_h)
    boxes_ref[0, 2] = jnp.clip(pred_ctr_x + half_w, 0.0, img_w)
    boxes_ref[0, 3] = jnp.clip(pred_ctr_y + half_h, 0.0, img_h)

    # softmax over classes (classes on the sublane axis)
    logits = logits_ref[0]                    # (C, TN)
    m = jnp.max(logits, axis=0, keepdims=True)
    e = jnp.exp(logits - m)
    s = jnp.sum(e, axis=0, keepdims=True)
    scores_ref[0] = e * pl.reciprocal(s, approx=True)


def _decode_and_score(prop_t, logits_t, reg_t, image_shapes, tn):
    """prop_t (B,4,N), logits_t (B,C,N), reg_t (B,4,C,N), image_shapes (B,2)."""
    B, C, N = logits_t.shape
    nt = N // tn
    boxes4, scores = pl.pallas_call(
        _box_postprocess_kernel,
        grid=(B, nt),
        in_specs=[
            pl.BlockSpec(memory_space=pltpu.MemorySpace.SMEM),          # image_shapes
            pl.BlockSpec((1, 4, tn), lambda b, n: (b, 0, n)),           # proposals
            pl.BlockSpec((1, C, tn), lambda b, n: (b, 0, n)),           # logits
            pl.BlockSpec((1, 4, C, tn), lambda b, n: (b, 0, 0, n)),     # deltas
        ],
        out_specs=[
            pl.BlockSpec((1, 4, C, tn), lambda b, n: (b, 0, 0, n)),     # decoded boxes
            pl.BlockSpec((1, C, tn), lambda b, n: (b, 0, n)),           # softmax scores
        ],
        out_shape=[
            jax.ShapeDtypeStruct((B, 4, C, N), jnp.float32),
            jax.ShapeDtypeStruct((B, C, N), jnp.float32),
        ],
        compiler_params=pltpu.CompilerParams(
            dimension_semantics=("parallel", "parallel")),
    )(image_shapes, prop_t, logits_t, reg_t)
    return boxes4, scores


# ----------------------------------------------------------------------------
# Plain-JAX tail: thresholding, class-aware NMS, top-k (fixed-size padded)
# ----------------------------------------------------------------------------
def _pairwise_iou(a, b):
    # clamp widths/heights so degenerate boxes (x2 < x1) never create
    # negative areas / non-positive unions
    area_a = jnp.clip(a[:, 2] - a[:, 0], 0.0, None) * jnp.clip(a[:, 3] - a[:, 1], 0.0, None)
    area_b = jnp.clip(b[:, 2] - b[:, 0], 0.0, None) * jnp.clip(b[:, 3] - b[:, 1], 0.0, None)
    lt = jnp.maximum(a[:, None, :2], b[None, :, :2])
    rb = jnp.minimum(a[:, None, 2:], b[None, :, 2:])
    wh = jnp.clip(rb - lt, 0.0, None)
    inter = wh[..., 0] * wh[..., 1]
    union = area_a[:, None] + area_b[None, :] - inter
    return jnp.where(union > 0, inter / union, 0.0)


def _per_image_select(boxes4, scores):
    # boxes4: (4, C, N) plane-major straight from the kernel, scores: (C, N)
    C, N = scores.shape

    # drop background class 0, flatten to (4, M) / (M,) with M = (C-1)*N
    fg_boxes = boxes4[:, 1:, :].reshape(4, -1)
    fg_scores = scores[1:, :].reshape(-1)
    labels = jnp.broadcast_to(
        jnp.arange(1, C, dtype=jnp.int32)[:, None], (C - 1, N)).reshape(-1)
    M = fg_scores.shape[0]

    x1, y1, x2, y2 = fg_boxes[0], fg_boxes[1], fg_boxes[2], fg_boxes[3]
    valid = (fg_scores > SCORE_THRESH) \
        & ((x2 - x1) >= MIN_BOX_SIZE) & ((y2 - y1) >= MIN_BOX_SIZE)

    # cap NMS candidates with top_k (>> DETECTIONS_PER_IMG) so the IoU matrix
    # and the greedy loop are K x K instead of M x M
    K = min(NMS_TOPK, M)
    cand_scores, cand_idx = jax.lax.top_k(
        jnp.where(valid, fg_scores, -jnp.inf), K)
    cand_valid = valid[cand_idx]
    cand_boxes = jnp.stack(
        [x1[cand_idx], y1[cand_idx], x2[cand_idx], y2[cand_idx]], axis=-1)  # (K, 4)
    cand_labels = labels[cand_idx]

    # class-aware NMS via per-class coordinate offsets (torchvision batched_nms)
    max_coord = jnp.max(fg_boxes)
    nms_boxes = cand_boxes + (cand_labels.astype(cand_boxes.dtype)
                              * (max_coord + 1.0))[:, None]

    ious = _pairwise_iou(nms_boxes, nms_boxes)
    idx = jnp.arange(K)

    def body(i, keep):
        suppress = (ious[i] > NMS_THRESH) & (idx > i) & keep[i] & cand_valid[i]
        return keep & jnp.logical_not(suppress)

    keep = jax.lax.fori_loop(0, K, body, jnp.ones((K,), jnp.bool_))
    keep = keep & cand_valid

    # TODO(synk): torch returns variable-length per-image lists; here kept
    # detections (already score-sorted by top_k) are compacted to the front
    # and padded to DETECTIONS_PER_IMG (pad: box=0, score=0, label=-1).
    comp = jnp.argsort(jnp.logical_not(keep), stable=True)[:DETECTIONS_PER_IMG]
    kept = keep[comp]
    out_boxes = jnp.where(kept[:, None], cand_boxes[comp], 0.0)
    out_scores = jnp.where(kept, cand_scores[comp], 0.0)
    out_labels = jnp.where(kept, cand_labels[comp], -1)
    return out_boxes, out_scores, out_labels


@jax.jit
def maskrcnn_box_postprocess(proposals, class_logits, box_regression, image_shapes):
    """Equivalent of MaskRCNNBoxPostProcess.forward (padded fixed-size outputs)."""
    B, N, _ = proposals.shape
    C = class_logits.shape[-1]
    logits = class_logits.reshape(B, N, C)
    reg = box_regression.reshape(B, N, C, 4)

    # pad N up to a lane-dense multiple of 128; zero-padded proposals decode
    # to zero-size boxes and are dropped by the MIN_BOX_SIZE filter
    n_pad = (-N) % 128
    if n_pad:
        proposals = jnp.pad(proposals, ((0, 0), (0, n_pad), (0, 0)))
        logits = jnp.pad(logits, ((0, 0), (0, n_pad), (0, 0)))
        reg = jnp.pad(reg, ((0, 0), (0, n_pad), (0, 0), (0, 0)))
    Np = N + n_pad
    tn = next(t for t in (512, 256, 128) if Np % t == 0)

    # TODO(synk): ideally the upstream box head emits plane-major tensors
    # ((B,4,C,N) / (B,C,N)) so these layout transposes disappear entirely.
    prop_t = proposals.transpose(0, 2, 1)          # (B, 4, Np)
    logits_t = logits.transpose(0, 2, 1)           # (B, C, Np)
    reg_t = reg.transpose(0, 3, 2, 1)              # (B, 4, C, Np)

    boxes4, scores = _decode_and_score(prop_t, logits_t, reg_t, image_shapes, tn)
    # no post-kernel transpose: the selection tail consumes (4, C, N) directly
    return jax.vmap(_per_image_select)(boxes4, scores)


# ----------------------------------------------------------------------------
# Pallas kernel 2: mask post-process (maskrcnn_inference)
#   per-detection gather of the predicted class' mask plane + sigmoid.
#   Scalar-prefetched labels drive a data-dependent index_map so only the
#   selected (1, H, W) plane is DMA'd per detection.
# ----------------------------------------------------------------------------
def _mask_postprocess_kernel(labels_ref, mask_ref, out_ref):
    del labels_ref  # only used by the index_map gather
    x = mask_ref[...]                              # (1, 1, H, W)
    out_ref[...] = 1.0 / (1.0 + jnp.exp(-x))       # sigmoid


@jax.jit
def maskrcnn_mask_postprocess(mask_logits, labels):
    """Equivalent of MaskRCNNMaskPostProcess.forward / maskrcnn_inference."""
    D, C, H, W = mask_logits.shape
    # padded detections carry label -1; clamp so the gather index stays valid
    lab = jnp.clip(labels.astype(jnp.int32), 0, C - 1)
    return pl.pallas_call(
        _mask_postprocess_kernel,
        grid_spec=pltpu.PrefetchScalarGridSpec(
            num_scalar_prefetch=1,
            grid=(D,),
            in_specs=[
                pl.BlockSpec((1, 1, H, W), lambda d, lab_ref: (d, lab_ref[d], 0, 0)),
            ],
            out_specs=pl.BlockSpec((1, 1, H, W), lambda d, lab_ref: (d, 0, 0, 0)),
        ),
        out_shape=jax.ShapeDtypeStruct((D, 1, H, W), jnp.float32),
        compiler_params=pltpu.CompilerParams(
            dimension_semantics=("arbitrary",)),
    )(lab, mask_logits)


# ----------------------------------------------------------------------------
# Pure-JAX references for the in-kernel math
# ----------------------------------------------------------------------------
def _ref_decode_clip(proposals, box_regression, image_shapes):
    B, N, _ = proposals.shape
    C = box_regression.shape[-1] // 4
    reg = box_regression.reshape(B, N, C, 4)
    wx, wy, ww, wh = BOX_CODER_WEIGHTS
    widths = proposals[..., 2:3] - proposals[..., 0:1]
    heights = proposals[..., 3:4] - proposals[..., 1:2]
    ctr_x = proposals[..., 0:1] + 0.5 * widths
    ctr_y = proposals[..., 1:2] + 0.5 * heights
    dx = reg[..., 0] / wx
    dy = reg[..., 1] / wy
    dw = jnp.minimum(reg[..., 2] / ww, BBOX_XFORM_CLIP)
    dh = jnp.minimum(reg[..., 3] / wh, BBOX_XFORM_CLIP)
    pcx = dx * widths + ctr_x
    pcy = dy * heights + ctr_y
    pw = jnp.exp(dw) * widths
    ph = jnp.exp(dh) * heights
    x1 = pcx - 0.5 * pw
    y1 = pcy - 0.5 * ph
    x2 = pcx + 0.5 * pw
    y2 = pcy + 0.5 * ph
    img_h = image_shapes[:, 0][:, None, None]
    img_w = image_shapes[:, 1][:, None, None]
    x1 = jnp.clip(x1, 0.0, img_w)
    x2 = jnp.clip(x2, 0.0, img_w)
    y1 = jnp.clip(y1, 0.0, img_h)
    y2 = jnp.clip(y2, 0.0, img_h)
    return jnp.stack([x1, y1, x2, y2], axis=-1)   # (B, N, C, 4)


def _ref_mask_postprocess(mask_logits, labels):
    D, C, _, _ = mask_logits.shape
    lab = jnp.clip(labels.astype(jnp.int32), 0, C - 1)
    probs = jax.nn.sigmoid(mask_logits)
    return probs[jnp.arange(D), lab][:, None]     # (D, 1, H, W)


if __name__ == "__main__":
    B, N, C = 2, 128, 8
    MASK_H = MASK_W = 28
    key = jax.random.PRNGKey(0)
    k1, k2, k3, k4, k5, k6, k7 = jax.random.split(key, 7)

    x1 = jax.random.uniform(k1, (B, N, 1), minval=0.0, maxval=80.0)
    y1 = jax.random.uniform(k2, (B, N, 1), minval=0.0, maxval=60.0)
    w = jax.random.uniform(k3, (B, N, 1), minval=4.0, maxval=60.0)
    h = jax.random.uniform(k4, (B, N, 1), minval=4.0, maxval=60.0)
    proposals = jnp.concatenate([x1, y1, x1 + w, y1 + h], axis=-1).astype(jnp.float32)

    class_logits = (jax.random.normal(k5, (B * N, C)) * 2.0).astype(jnp.float32)
    box_regression = (jax.random.normal(k6, (B * N, 4 * C)) * 0.5).astype(jnp.float32)
    image_shapes = jnp.array([[120.0, 160.0], [100.0, 128.0]], jnp.float32)  # (h, w)

    # --- sanity-check the box-decode kernel against a pure-JAX reference ---
    prop_t = proposals.transpose(0, 2, 1)
    logits_t = class_logits.reshape(B, N, C).transpose(0, 2, 1)
    reg_t = box_regression.reshape(B, N, C, 4).transpose(0, 3, 2, 1)
    decode = jax.jit(functools.partial(_decode_and_score, tn=128))
    k_boxes4, k_scores = jax.block_until_ready(
        decode(prop_t, logits_t, reg_t, image_shapes))

    ref_boxes = _ref_decode_clip(proposals, box_regression, image_shapes)
    ref_scores = jax.nn.softmax(class_logits.reshape(B, N, C), axis=-1)
    assert jnp.allclose(k_boxes4.transpose(0, 3, 2, 1), ref_boxes, atol=1e-4, rtol=1e-4)
    assert jnp.allclose(k_scores.transpose(0, 2, 1), ref_scores, atol=5e-3, rtol=5e-3)

    # --- full box post-process (decode kernel + NMS/top-k tail) ---
    boxes, scores, labels = jax.block_until_ready(
        maskrcnn_box_postprocess(proposals, class_logits, box_regression, image_shapes))
    assert boxes.shape == (B, DETECTIONS_PER_IMG, 4)
    assert scores.shape == (B, DETECTIONS_PER_IMG)
    assert labels.shape == (B, DETECTIONS_PER_IMG)
    assert bool(jnp.all(jnp.isfinite(boxes))) and bool(jnp.all(jnp.isfinite(scores)))

    # --- mask post-process kernel (label gather + sigmoid) ---
    D = B * DETECTIONS_PER_IMG
    mask_logits = (jax.random.normal(k7, (D, C, MASK_H, MASK_W)) * 1.5).astype(jnp.float32)
    det_labels = labels.reshape(-1)
    mask_probs = jax.block_until_ready(
        maskrcnn_mask_postprocess(mask_logits, det_labels))
    ref_probs = _ref_mask_postprocess(mask_logits, det_labels)
    assert mask_probs.shape == (D, 1, MASK_H, MASK_W)
    assert jnp.allclose(mask_probs, ref_probs, atol=1e-4, rtol=1e-4)

    print("KERNEL_OK")
</pallas_src>

<mosaic_0001>
module attributes {stable_mosaic.version = 11 : i64} {
  func.func @_box_postprocess_kernel(%arg0: i32, %arg1: i32, %arg2: memref<2x2xf32, #tpu.memory_space<smem>>, %arg3: memref<1x4x128xf32, #tpu.memory_space<vmem>>, %arg4: memref<1x8x128xf32, #tpu.memory_space<vmem>>, %arg5: memref<1x4x8x128xf32, #tpu.memory_space<vmem>>, %arg6: memref<1x4x8x128xf32, #tpu.memory_space<vmem>>, %arg7: memref<1x8x128xf32, #tpu.memory_space<vmem>>) attributes {dimension_semantics = [#tpu.dimension_semantics<parallel>, #tpu.dimension_semantics<parallel>], iteration_bounds = array<i64: 2, 1>, scalar_prefetch = 0 : i64, scratch_operands = 0 : i64, tpu.core_type = #tpu.core_type<tc>, window_params = [{transform_indices = @transform_0, window_bounds = array<i64: 2, 2>}, {transform_indices = @transform_1, window_bounds = array<i64: 1, 4, 128>}, {transform_indices = @transform_2, window_bounds = array<i64: 1, 8, 128>}, {transform_indices = @transform_3, window_bounds = array<i64: 1, 4, 8, 128>}, {transform_indices = @transform_4, window_bounds = array<i64: 1, 4, 8, 128>}, {transform_indices = @transform_5, window_bounds = array<i64: 1, 8, 128>}]} {
    %0 = arith.index_cast %arg0 : i32 to index
    %c0 = arith.constant 0 : index
    %1 = memref.load %arg2[%0, %c0] : memref<2x2xf32, #tpu.memory_space<smem>>
    %2 = arith.index_cast %arg0 : i32 to index
    %c1 = arith.constant 1 : index
    %3 = memref.load %arg2[%2, %c1] : memref<2x2xf32, #tpu.memory_space<smem>>
    %c0_0 = arith.constant 0 : index
    %c0_1 = arith.constant 0 : index
    %c0_2 = arith.constant 0 : index
    %4 = vector.load %arg3[%c0_0, %c0_1, %c0_2] : memref<1x4x128xf32, #tpu.memory_space<vmem>>, vector<1x4x128xf32>
    %5 = vector.shape_cast %4 : vector<1x4x128xf32> to vector<4x128xf32>
    %6 = vector.extract_strided_slice %5 {offsets = [0, 0], sizes = [1, 128], strides = [1, 1]} : vector<4x128xf32> to vector<1x128xf32>
    %7 = vector.extract_strided_slice %5 {offsets = [1, 0], sizes = [1, 128], strides = [1, 1]} : vector<4x128xf32> to vector<1x128xf32>
    %8 = vector.extract_strided_slice %5 {offsets = [2, 0], sizes = [1, 128], strides = [1, 1]} : vector<4x128xf32> to vector<1x128xf32>
    %9 = vector.extract_strided_slice %5 {offsets = [3, 0], sizes = [1, 128], strides = [1, 1]} : vector<4x128xf32> to vector<1x128xf32>
    %10 = arith.subf %8, %6 : vector<1x128xf32>
    %11 = arith.subf %9, %7 : vector<1x128xf32>
    %cst = arith.constant 5.000000e-01 : f32
    %12 = vector.broadcast %cst : f32 to vector<1x128xf32>
    %13 = arith.mulf %12, %10 : vector<1x128xf32>
    %14 = arith.addf %6, %13 : vector<1x128xf32>
    %cst_3 = arith.constant 5.000000e-01 : f32
    %15 = vector.broadcast %cst_3 : f32 to vector<1x128xf32>
    %16 = arith.mulf %15, %11 : vector<1x128xf32>
    %17 = arith.addf %7, %16 : vector<1x128xf32>
    %c0_4 = arith.constant 0 : index
    %c0_5 = arith.constant 0 : index
    %c0_6 = arith.constant 0 : index
    %c0_7 = arith.constant 0 : index
    %18 = vector.load %arg5[%c0_4, %c0_5, %c0_6, %c0_7] : memref<1x4x8x128xf32, #tpu.memory_space<vmem>>, vector<1x4x8x128xf32>
    %19 = vector.shape_cast %18 : vector<1x4x8x128xf32> to vector<4x8x128xf32>
    %20 = vector.extract_strided_slice %19 {offsets = [0, 0, 0], sizes = [1, 8, 128], strides = [1, 1, 1]} : vector<4x8x128xf32> to vector<1x8x128xf32>
    %21 = vector.shape_cast %20 : vector<1x8x128xf32> to vector<8x128xf32>
    %cst_8 = arith.constant 1.000000e-01 : f32
    %22 = vector.broadcast %cst_8 : f32 to vector<8x128xf32>
    %23 = arith.mulf %21, %22 : vector<8x128xf32>
    %24 = vector.extract_strided_slice %19 {offsets = [1, 0, 0], sizes = [1, 8, 128], strides = [1, 1, 1]} : vector<4x8x128xf32> to vector<1x8x128xf32>
    %25 = vector.shape_cast %24 : vector<1x8x128xf32> to vector<8x128xf32>
    %cst_9 = arith.constant 1.000000e-01 : f32
    %26 = vector.broadcast %cst_9 : f32 to vector<8x128xf32>
    %27 = arith.mulf %25, %26 : vector<8x128xf32>
    %28 = vector.extract_strided_slice %19 {offsets = [2, 0, 0], sizes = [1, 8, 128], strides = [1, 1, 1]} : vector<4x8x128xf32> to vector<1x8x128xf32>
    %29 = vector.shape_cast %28 : vector<1x8x128xf32> to vector<8x128xf32>
    %cst_10 = arith.constant 2.000000e-01 : f32
    %30 = vector.broadcast %cst_10 : f32 to vector<8x128xf32>
    %31 = arith.mulf %29, %30 : vector<8x128xf32>
    %cst_11 = arith.constant 4.13516665 : f32
    %32 = vector.broadcast %cst_11 : f32 to vector<8x128xf32>
    %33 = arith.minimumf %31, %32 : vector<8x128xf32>
    %34 = vector.extract_strided_slice %19 {offsets = [3, 0, 0], sizes = [1, 8, 128], strides = [1, 1, 1]} : vector<4x8x128xf32> to vector<1x8x128xf32>
    %35 = vector.shape_cast %34 : vector<1x8x128xf32> to vector<8x128xf32>
    %cst_12 = arith.constant 2.000000e-01 : f32
    %36 = vector.broadcast %cst_12 : f32 to vector<8x128xf32>
    %37 = arith.mulf %35, %36 : vector<8x128xf32>
    %cst_13 = arith.constant 4.13516665 : f32
    %38 = vector.broadcast %cst_13 : f32 to vector<8x128xf32>
    %39 = arith.minimumf %37, %38 : vector<8x128xf32>
    %40 = vector.broadcast %10 : vector<1x128xf32> to vector<8x128xf32>
    %41 = arith.mulf %23, %40 : vector<8x128xf32>
    %42 = vector.broadcast %14 : vector<1x128xf32> to vector<8x128xf32>
    %43 = arith.addf %41, %42 : vector<8x128xf32>
    %44 = vector.broadcast %11 : vector<1x128xf32> to vector<8x128xf32>
    %45 = arith.mulf %27, %44 : vector<8x128xf32>
    %46 = vector.broadcast %17 : vector<1x128xf32> to vector<8x128xf32>
    %47 = arith.addf %45, %46 : vector<8x128xf32>
    %48 = math.exp %33 : vector<8x128xf32>
    %49 = vector.broadcast %10 : vector<1x128xf32> to vector<8x128xf32>
    %50 = arith.mulf %48, %49 : vector<8x128xf32>
    %cst_14 = arith.constant 5.000000e-01 : f32
    %51 = vector.broadcast %cst_14 : f32 to vector<8x128xf32>
    %52 = arith.mulf %51, %50 : vector<8x128xf32>
    %53 = math.exp %39 : vector<8x128xf32>
    %54 = vector.broadcast %11 : vector<1x128xf32> to vector<8x128xf32>
    %55 = arith.mulf %53, %54 : vector<8x128xf32>
    %cst_15 = arith.constant 5.000000e-01 : f32
    %56 = vector.broadcast %cst_15 : f32 to vector<8x128xf32>
    %57 = arith.mulf %56, %55 : vector<8x128xf32>
    %58 = arith.subf %43, %52 : vector<8x128xf32>
    %cst_16 = arith.constant 0.000000e+00 : f32
    %59 = vector.broadcast %cst_16 : f32 to vector<8x128xf32>
    %60 = arith.maximumf %59, %58 : vector<8x128xf32>
    %61 = vector.broadcast %3 : f32 to vector<8x128xf32>
    %62 = arith.minimumf %61, %60 : vector<8x128xf32>
    %c0_17 = arith.constant 0 : index
    %c0_18 = arith.constant 0 : index
    %c0_19 = arith.constant 0 : index
    %c0_20 = arith.constant 0 : index
    %63 = vector.load %arg6[%c0_17, %c0_18, %c0_19, %c0_20] : memref<1x4x8x128xf32, #tpu.memory_space<vmem>>, vector<1x1x8x128xf32>
    %64 = vector.shape_cast %63 : vector<1x1x8x128xf32> to vector<8x128xf32>
    %65 = vector.shape_cast %62 : vector<8x128xf32> to vector<1x1x8x128xf32>
    tpu.vector_store %arg6[%c0_17, %c0_18, %c0_19, %c0_20], %65 {strides = array<i32>} : memref<1x4x8x128xf32, #tpu.memory_space<vmem>>, vector<1x1x8x128xf32>,
    %66 = arith.subf %47, %57 : vector<8x128xf32>
    %cst_21 = arith.constant 0.000000e+00 : f32
    %67 = vector.broadcast %cst_21 : f32 to vector<8x128xf32>
    %68 = arith.maximumf %67, %66 : vector<8x128xf32>
    %69 = vector.broadcast %1 : f32 to vector<8x128xf32>
    %70 = arith.minimumf %69, %68 : vector<8x128xf32>
    %c0_22 = arith.constant 0 : index
    %c1_23 = arith.constant 1 : index
    %c0_24 = arith.constant 0 : index
    %c0_25 = arith.constant 0 : index
    %71 = vector.load %arg6[%c0_22, %c1_23, %c0_24, %c0_25] : memref<1x4x8x128xf32, #tpu.memory_space<vmem>>, vector<1x1x8x128xf32>
    %72 = vector.shape_cast %71 : vector<1x1x8x128xf32> to vector<8x128xf32>
    %73 = vector.shape_cast %70 : vector<8x128xf32> to vector<1x1x8x128xf32>
    tpu.vector_store %arg6[%c0_22, %c1_23, %c0_24, %c0_25], %73 {strides = array<i32>} : memref<1x4x8x128xf32, #tpu.memory_space<vmem>>, vector<1x1x8x128xf32>,
    %74 = arith.addf %43, %52 : vector<8x128xf32>
    %cst_26 = arith.constant 0.000000e+00 : f32
    %75 = vector.broadcast %cst_26 : f32 to vector<8x128xf32>
    %76 = arith.maximumf %75, %74 : vector<8x128xf32>
    %77 = vector.broadcast %3 : f32 to vector<8x128xf32>
    %78 = arith.minimumf %77, %76 : vector<8x128xf32>
    %c0_27 = arith.constant 0 : index
    %c2 = arith.constant 2 : index
    %c0_28 = arith.constant 0 : index
    %c0_29 = arith.constant 0 : index
    %79 = vector.load %arg6[%c0_27, %c2, %c0_28, %c0_29] : memref<1x4x8x128xf32, #tpu.memory_space<vmem>>, vector<1x1x8x128xf32>
    %80 = vector.shape_cast %79 : vector<1x1x8x128xf32> to vector<8x128xf32>
    %81 = vector.shape_cast %78 : vector<8x128xf32> to vector<1x1x8x128xf32>
    tpu.vector_store %arg6[%c0_27, %c2, %c0_28, %c0_29], %81 {strides = array<i32>} : memref<1x4x8x128xf32, #tpu.memory_space<vmem>>, vector<1x1x8x128xf32>,
    %82 = arith.addf %47, %57 : vector<8x128xf32>
    %cst_30 = arith.constant 0.000000e+00 : f32
    %83 = vector.broadcast %cst_30 : f32 to vector<8x128xf32>
    %84 = arith.maximumf %83, %82 : vector<8x128xf32>
    %85 = vector.broadcast %1 : f32 to vector<8x128xf32>
    %86 = arith.minimumf %85, %84 : vector<8x128xf32>
    %c0_31 = arith.constant 0 : index
    %c3 = arith.constant 3 : index
    %c0_32 = arith.constant 0 : index
    %c0_33 = arith.constant 0 : index
    %87 = vector.load %arg6[%c0_31, %c3, %c0_32, %c0_33] : memref<1x4x8x128xf32, #tpu.memory_space<vmem>>, vector<1x1x8x128xf32>
    %88 = vector.shape_cast %87 : vector<1x1x8x128xf32> to vector<8x128xf32>
    %89 = vector.shape_cast %86 : vector<8x128xf32> to vector<1x1x8x128xf32>
    tpu.vector_store %arg6[%c0_31, %c3, %c0_32, %c0_33], %89 {strides = array<i32>} : memref<1x4x8x128xf32, #tpu.memory_space<vmem>>, vector<1x1x8x128xf32>,
    %c0_34 = arith.constant 0 : index
    %c0_35 = arith.constant 0 : index
    %c0_36 = arith.constant 0 : index
    %90 = vector.load %arg4[%c0_34, %c0_35, %c0_36] : memref<1x8x128xf32, #tpu.memory_space<vmem>>, vector<1x8x128xf32>
    %91 = vector.shape_cast %90 : vector<1x8x128xf32> to vector<8x128xf32>
    %cst_37 = arith.constant dense<0xFF800000> : vector<128xf32>
    %92 = vector.multi_reduction <maximumf>, %91, %cst_37 [0] : vector<8x128xf32> to vector<128xf32>
    %93 = vector.shape_cast %92 : vector<128xf32> to vector<1x128xf32>
    %94 = vector.broadcast %93 : vector<1x128xf32> to vector<8x128xf32>
    %95 = arith.subf %91, %94 : vector<8x128xf32>
    %96 = math.exp %95 : vector<8x128xf32>
    %cst_38 = arith.constant dense<0.000000e+00> : vector<128xf32>
    %97 = vector.multi_reduction <add>, %96, %cst_38 [0] : vector<8x128xf32> to vector<128xf32>
    %98 = vector.shape_cast %97 : vector<128xf32> to vector<1x128xf32>
    %99 = tpu.reciprocal %98 {approx = true} : vector<1x128xf32> -> vector<1x128xf32>
    %100 = vector.broadcast %99 : vector<1x128xf32> to vector<8x128xf32>
    %101 = arith.mulf %96, %100 : vector<8x128xf32>
    %c0_39 = arith.constant 0 : index
    %c0_40 = arith.constant 0 : index
    %c0_41 = arith.constant 0 : index
    %102 = vector.load %arg7[%c0_39, %c0_40, %c0_41] : memref<1x8x128xf32, #tpu.memory_space<vmem>>, vector<1x8x128xf32>
    %103 = vector.shape_cast %102 : vector<1x8x128xf32> to vector<8x128xf32>
    %104 = vector.shape_cast %101 : vector<8x128xf32> to vector<1x8x128xf32>
    tpu.vector_store %arg7[%c0_39, %c0_40, %c0_41], %104 {strides = array<i32>} : memref<1x8x128xf32, #tpu.memory_space<vmem>>, vector<1x8x128xf32>,
    return
  }
  func.func @transform_0(%arg0: i32, %arg1: i32) -> (i32, i32) {
    %c0_i32 = arith.constant 0 : i32
    %c0_i32_0 = arith.constant 0 : i32
    %c0_i32_1 = arith.constant 0 : i32
    return %c0_i32, %c0_i32_0 : i32, i32
  }
  func.func @transform_1(%arg0: i32, %arg1: i32) -> (i32, i32, i32) {
    %c0_i32 = arith.constant 0 : i32
    %c0_i32_0 = arith.constant 0 : i32
    return %arg0, %c0_i32, %arg1 : i32, i32, i32
  }
  func.func @transform_2(%arg0: i32, %arg1: i32) -> (i32, i32, i32) {
    %c0_i32 = arith.constant 0 : i32
    %c0_i32_0 = arith.constant 0 : i32
    return %arg0, %c0_i32, %arg1 : i32, i32, i32
  }
  func.func @transform_3(%arg0: i32, %arg1: i32) -> (i32, i32, i32, i32) {
    %c0_i32 = arith.constant 0 : i32
    %c0_i32_0 = arith.constant 0 : i32
    %c0_i32_1 = arith.constant 0 : i32
    return %arg0, %c0_i32, %c0_i32_0, %arg1 : i32, i32, i32, i32
  }
  func.func @transform_4(%arg0: i32, %arg1: i32) -> (i32, i32, i32, i32) {
    %c0_i32 = arith.constant 0 : i32
    %c0_i32_0 = arith.constant 0 : i32
    %c0_i32_1 = arith.constant 0 : i32
    return %arg0, %c0_i32, %c0_i32_0, %arg1 : i32, i32, i32, i32
  }
  func.func @transform_5(%arg0: i32, %arg1: i32) -> (i32, i32, i32) {
    %c0_i32 = arith.constant 0 : i32
    %c0_i32_0 = arith.constant 0 : i32
    return %arg0, %c0_i32, %arg1 : i32, i32, i32
  }
}

</mosaic_0001>

<bundles_post_ra>
// kernel: _decode_and_score.1
= control target key start
LH: loop header
LB: loop body
LE: loop exit
PB: predicated region body
PF: predicated region fallthrough
CT: control target
= control target key end

     0   :  { %s1398_s0 = inlined_call_operand.vmem [shape: f32[2,2], index: 0, kind: input, shape index: {}]   ;;  %s1399_s1 = inlined_call_operand.hbm [shape: f32[2,4,128], index: 1, kind: input, shape index: {}]   ;;  %s1400_s2 = inlined_call_operand.hbm [shape: f32[2,8,128], index: 2, kind: input, shape index: {}]   ;;  %s1401_s3 = inlined_call_operand.hbm [shape: f32[2,4,8,128], index: 3, kind: input, shape index: {}]   ;;  %s1402_s4 = inlined_call_operand.hbm [shape: f32[2,4,8,128], index: 4, kind: output, shape index: {0}]   ;;  %s1403_s5 = inlined_call_operand.hbm [shape: f32[2,8,128], index: 5, kind: output, shape index: {1}]  }
   0x1   :  { %1410 = sst [smem:[#allocation20_spill]] %s1398_s0 }
   0x2   :  { %1411 = sst [smem:[#allocation21_spill]] %s1400_s2 }
   0x3   :  { %11 = vsyncpa [#allocation5], 0 }
   0x4   :  { %12 = vsyncpa [#allocation3], 0 }
   0x5   :  { %14 = vsyncpa [#allocation3 + $0x1], 0 }
   0x6   :  { %15 = vsyncpa [#allocation8], 0 }
   0x7   :  { %17 = vsyncpa [#allocation8 + $0x1], 0 }
   0x8   :  { %18 = vsyncpa [#allocation4], 0 }
   0x9   :  { %20 = vsyncpa [#allocation4 + $0x1], 0 }
   0xa   :  { %21 = vsyncpa [#allocation12], 0 }
   0xb   :  { %23 = vsyncpa [#allocation12 + $0x1], 0  ;;  %s1066_s18 = smov 0   ;;  %s1068_s19 = smov 0  }
   0xc   :  { %s1070_s20 = smov 0   ;;  %s1072_s21 = smov 0  }
   0xd   :  { %s1074_s22 = smov 0   ;;  %s1076_s23 = smov 0  }
   0xe LB: > { %s41_s24 = sadd.s32 1, %s1020_s22  ;;  %s71_s25 = sadd.s32 1, %s1012_s20  ;;  %s1024_s23 = sphi %s1076_s23, %s29_s23   ;;  %s1020_s22 = sphi %s1074_s22, %s1439_s22   ;;  %s1016_s21 = sphi %s1072_s21, %s1438_s21   ;;  %s1012_s20 = sphi %s1070_s20, %s1437_s20   ;;  %s1008_s19 = sphi %s1068_s19, %s1436_s19   ;;  %s1004_s18 = sphi %s1066_s18, %s1435_s18  }
   0xf   : > { %p43_p0 = scmp.ge.s32.totalorder %s41_s24, 2  ;;  %p1404_p1 = scmp.ne.s32.totalorder %s1012_s20, %s1008_s19 }
  0x10   : > { %p79_p2 = scmp.eq.s32.totalorder %s1024_s23, 0  ;;  %p733_p5 = scmp.lt.s32.totalorder %s1024_s23, 2 }
  0x11   : > { %s1441_s24 = smov (%p43_p0, %s41_s24), 0  ;;  %s1111_s27 = sand.u32 1, %s1012_s20  }
  0x12   : > { %1412 = sst [smem:[#allocation18_spill]] %s1441_s24  ;;  %p80_p4 = por %p79_p2, %p1404_p1 }
  0x13   : > { %s66_s26 = ssub.s32 %s1020_s22, %s1441_s24  ;;  %s250_s29 = sand.u32 1, %s1024_s23  }
  0x14   : > { %p69_p6 = scmp.eq.s32.totalorder %s66_s26, 0  ;;  %p1113_p7 = pnand %p733_p5, %p80_p4 }
  0x15   : > { %s672_s30 = sshll.u32 %s1111_s27, 3  ;;  %s673_s7 = sshll.u32 %s1020_s22, 7 }
  0x16   : > { %s1120_s6 = scalar_select %p69_p6, %s1012_s20, %s71_s25  }
  0x17   : > { %s1415_s2 = sld [smem:[#allocation21_spill]]  ;;  %s254_s11 = scalar_lea.vmem [#allocation7], %s672_s30 }
  0x18   : > { %1414 = sst [smem:[#allocation19_spill]] %s1120_s6  ;;  %s262_s12 = sshll.u32 %s254_s11, 4  ;;  %s1128_s12 = int_to_ptr.vmem [resolvable:$true] %s262_s12 }
  0x19   : > { %s1131_s14 = scalar_lea.sflag [#allocation8], %s250_s29  ;;  %p1137_p9 = pneg %p1113_p7 }
  0x1d   : > { %s1126_s10 = scalar_lea.hbm %s1415_s2, %s673_s7  ;;  %s802_s26 = scalar_lea.hbm %s1415_s2, 256 }
  0x1e   : > { %s797_s15 = scalar_lea.hbm %s1126_s10, 128  ;;  %p803_p12 = scmp.lt.u32.totalorder %s1126_s10, %s1415_s2 }
  0x1f   : > { %p798_p8 = scmp.ne.s32.totalorder %s1126_s10, %s797_s15  ;;  %p804_p13 = scmp.lt.u32.totalorder %s802_s26, %s797_s15 }
  0x20   : > { %p806_p2 = scmp.lt.u32.totalorder %s797_s15, %s1126_s10 }
  0x21   : > { %p800_p10 = pnand %p1137_p9, %p798_p8  ;;  %p805_p0 = por %p804_p13, %p803_p12 }
  0x23   : > { %p801_p11 = pneg %p800_p10  ;;  %p807_p4 = por %p806_p2, %p805_p0 }
  0x25   : > { %p808_p5 = pnand %p807_p4, %p801_p11 }
  0x27   : > { %811 = shalt.err (!%p808_p5)
}
  0x28   : > { %s812_s29 = scalar_lea.vmem %s1128_s12, 128  ;;  %s1026_s8 = smov [#allocation7]  }
  0x29   : > { %p813_p6 = scmp.ne.s32.totalorder %s1128_s12, %s812_s29  ;;  %s817_s9 = sshll.u32 %s1026_s8, 4  ;;  %s818_s9 = int_to_ptr.vmem [resolvable:$false] %s817_s9 }
  0x2a   : > { %s819_s11 = scalar_lea.vmem %s818_s9, 256  ;;  %p820_p3 = scmp.lt.s32.totalorder %s1128_s12, %s818_s9 }
  0x2b   : > { %p815_p8 = pnand %p813_p6, %p1137_p9  ;;  %p821_p1 = scmp.lt.s32.totalorder %s819_s11, %s812_s29 }
  0x2d   : > { %p816_p10 = pneg %p815_p8  ;;  %p822_p12 = por %p821_p1, %p820_p3 }
  0x2f   : > { %p823_p13 = pnand %p822_p12, %p816_p10 }
  0x31   : > { %826 = shalt.err (!%p823_p13)
}
  0x32   : > { %721 = dma.hbm_to_vmem [thread:$0]  (!%p1113_p7), %s1126_s10, 128, %s1128_s12, %s1131_s14  }
  0x33   : > { %s1162_s15 = sadd.s32 4294967295, %s1024_s23   ;;  %s666_s17 = sadd.s32 4294967294, %s1024_s23  }
  0x34   : > { %p84_p1 = scmp.ne.s32.totalorder %s1008_s19, %s1004_s18  ;;  %p1406_p3 = scmp.eq.s32.totalorder %s1162_s15, 0 }
  0x35   : > { %p166_p11 = scmp.eq.s32.totalorder %s1162_s15, 1  ;;  %p172_p0 = scmp.eq.s32.totalorder %s666_s17, 1 }
  0x36   : > { %p1171_p2 = por %p1406_p3, %p84_p1  ;;  %p667_p4 = scmp.ge.s32.totalorder %s1024_s23, 1 }
  0x37   : > { %p1418_p5 = scmp.ne.s32.totalorder %s1012_s20, %s1008_s19  ;;  %p1183_p8 = por %p172_p0, %p84_p1 }
  0x38   : > { %s1417_s25 = scalar_select %p1171_p2, 1, 0 }
  0x39   : > { %p1179_p6 = por %p166_p11, %p1418_p5  ;;  %p207_p10 = scmp.lt.s32.totalorder %s1024_s23, 3 }
  0x3a   : > { %s1420_s12 = scalar_select %p1183_p8, 1, 0 }
  0x3b   : > { %s1419_s10 = scalar_select %p1179_p6, 1, 0 }
  0x3c   : > { %s1421_s0 = sld [smem:[#allocation20_spill]]  ;;  %p1191_p12 = pnand %p667_p4, %p207_p10 }
  0x3d   : > { %s670_s8 = sshll.u32 %s1111_s27, 2  ;;  %s671_s9 = sshll.u32 %s1020_s22, 6 }
  0x3e   : > { %s1422_s29 = scalar_select %p1191_p12, 1, 0 }
  0x3f   : > { %p711_p13 = pneg %p1191_p12  ;;  %s235_s11 = scalar_lea.vmem [#allocation6], %s670_s8 }
  0x40   : > { %s243_s17 = sshll.u32 %s235_s11, 4  ;;  %s1208_s30 = scalar_lea.hbm %s1399_s1, %s671_s9  ;;  %s1210_s17 = int_to_ptr.vmem [resolvable:$true] %s243_s17 }
  0x41   : > { %p1201_p1 = pnand %p711_p13, %p1406_p3 }
  0x42   : > { %s220_s7 = sshll.u32 %s1421_s0, 4  ;;  %s221_s7 = int_to_ptr.vmem [resolvable:$true] %s220_s7 }
  0x43   : > { %s827_s24 = scalar_lea.vmem %s221_s7, 32  ;;  %p829_p0 = pneg %p1201_p1 }
  0x44   : > { %p828_p11 = scmp.ne.s32.totalorder %s221_s7, %s827_s24  ;;  %p835_p10 = scmp.lt.s32.totalorder %s221_s7, %s221_s7 }
  0x45   : > { %p836_p13 = scmp.lt.s32.totalorder %s827_s24, %s827_s24 }
  0x46   : > { %p830_p4 = pnand %p829_p0, %p828_p11 }
  0x47   : > { %p837_p3 = por %p836_p13, %p835_p10 }
  0x48   : > { %p831_p5 = pneg %p830_p4 }
  0x4a   : > { %p838_p8 = pnand %p837_p3, %p831_p5 }
  0x4c   : > { %841 = shalt.err (!%p838_p8)
}
  0x4d   : > { %s1027_s8 = smov [#allocation2]   ;;  %s232_s2 = scalar_lea.sflag [#allocation3], %s1111_s27 }
  0x4e   : > { %714 = dma.vmem_to_smem (!%p1201_p1), %s221_s7, 32, %s1027_s8, [#allocation5]  }
  0x4f   : > { %s842_s9 = scalar_lea.hbm %s1208_s30, 64  ;;  %s847_s26 = scalar_lea.hbm %s1399_s1, 128 }
  0x50   : > { %p843_p6 = scmp.ne.s32.totalorder %s1208_s30, %s842_s9  ;;  %p848_p3 = scmp.lt.u32.totalorder %s1208_s30, %s1399_s1 }
  0x51   : > { %p849_p8 = scmp.lt.u32.totalorder %s847_s26, %s842_s9  ;;  %p851_p5 = scmp.lt.u32.totalorder %s842_s9, %s1208_s30 }
  0x52   : > { %p845_p11 = pnand %p843_p6, %p1137_p9 }
  0x53   : > { %p850_p4 = por %p849_p8, %p848_p3 }
  0x54   : > { %p846_p0 = pneg %p845_p11 }
  0x55   : > { %p852_p10 = por %p851_p5, %p850_p4 }
  0x57   : > { %p853_p13 = pnand %p852_p10, %p846_p0 }
  0x59   : > { %856 = shalt.err (!%p853_p13)
}
  0x5a   : > { %s857_s13 = scalar_lea.vmem %s1210_s17, 64  ;;  %s1028_s7 = smov [#allocation6]  }
  0x5b   : > { %p858_p6 = scmp.ne.s32.totalorder %s1210_s17, %s857_s13  ;;  %s862_s8 = sshll.u32 %s1028_s7, 4  ;;  %s863_s8 = int_to_ptr.vmem [resolvable:$false] %s862_s8 }
  0x5c   : > { %s864_s0 = scalar_lea.vmem %s863_s8, 128  ;;  %p865_p2 = scmp.lt.s32.totalorder %s1210_s17, %s863_s8 }
  0x5d   : > { %p860_p1 = pnand %p858_p6, %p1137_p9  ;;  %p866_p12 = scmp.lt.s32.totalorder %s864_s0, %s857_s13 }
  0x5f   : > { %p861_p11 = pneg %p860_p1  ;;  %p867_p3 = por %p866_p12, %p865_p2 }
  0x61   : > { %p868_p8 = pnand %p867_p3, %p861_p11 }
  0x63   : > { %871 = shalt.err (!%p868_p8)
}
  0x64   : > { %718 = dma.hbm_to_vmem [thread:$0]  (!%p1113_p7), %s1208_s30, 64, %s1210_s17, %s232_s2  }
  0x65   : > { %s1424_s6 = sshll.u32 %s1020_s22, 9  ;;  %s1425_s26 = sshll.u32 %s1111_s27, 5 }
  0x66   : > { %s1244_s11 = scalar_lea.hbm %s1401_s3, %s1424_s6  ;;  %s273_s13 = scalar_lea.vmem [#allocation9], %s1425_s26 }
  0x67   : > { %s281_s7 = sshll.u32 %s273_s13, 4  ;;  %s872_s8 = scalar_lea.hbm %s1244_s11, 512  ;;  %s1248_s7 = int_to_ptr.vmem [resolvable:$true] %s281_s7 }
  0x68   : > { %p873_p2 = scmp.ne.s32.totalorder %s1244_s11, %s872_s8  ;;  %s877_s2 = scalar_lea.hbm %s1401_s3, 1024 }
  0x69   : > { %p878_p4 = scmp.lt.u32.totalorder %s1244_s11, %s1401_s3  ;;  %p879_p5 = scmp.lt.u32.totalorder %s877_s2, %s872_s8 }
  0x6a   : > { %p875_p12 = pnand %p873_p2, %p1137_p9  ;;  %p881_p13 = scmp.lt.u32.totalorder %s872_s8, %s1244_s11 }
  0x6b   : > { %p880_p10 = por %p879_p5, %p878_p4 }
  0x6c   : > { %p876_p0 = pneg %p875_p12 }
  0x6d   : > { %p882_p6 = por %p881_p13, %p880_p10 }
  0x6f   : > { %p883_p1 = pnand %p882_p6, %p876_p0 }
  0x71   : > { %886 = shalt.err (!%p883_p1)
}
  0x72   : > { %s887_s27 = scalar_lea.vmem %s1248_s7, 512  ;;  %s1029_s9 = smov [#allocation9]  }
  0x73   : > { %p888_p11 = scmp.ne.s32.totalorder %s1248_s7, %s887_s27  ;;  %s892_s24 = sshll.u32 %s1029_s9, 4  ;;  %s893_s24 = int_to_ptr.vmem [resolvable:$false] %s892_s24 }
  0x74   : > { %s894_s26 = scalar_lea.vmem %s893_s24, 1024  ;;  %p895_p2 = scmp.lt.s32.totalorder %s1248_s7, %s893_s24 }
  0x75   : > { %p890_p3 = pnand %p888_p11, %p1137_p9  ;;  %p896_p12 = scmp.lt.s32.totalorder %s894_s26, %s887_s27 }
  0x77   : > { %p891_p8 = pneg %p890_p3  ;;  %p897_p4 = por %p896_p12, %p895_p2 }
  0x79   : > { %p898_p5 = pnand %p897_p4, %p891_p8 }
  0x7b   : > { %901 = shalt.err (!%p898_p5)
}
  0x7c   : > { %s1030_s13 = smov 128   ;;  %s1031_s8 = smov 8  }
  0x7d   : > { %724 = dma.hbm_to_vmem [thread:$0]  (!%p1113_p7), %s1244_s11, 512, %s1248_s7, %s1131_s14, %s1030_s13, %s1030_s13, %s1031_s8  }
  0x7e   : > { %p1426_p9 = scmp.ne.s32.totalorder %s1422_s29, 0 }
  0x7f   : > { %p1427_p0 = scmp.eq.s32.totalorder (!%p1426_p9), %s1162_s15, 0 }
  0x80   : > { %293 = sbr.rel (%p1426_p9) target bundleno = 225 (0xe1), region = 36 }
  0x87   : > { %983 = dma.done.wait (%p1427_p0), [#allocation5], 32   ;;  %p1428_p10 = pmov %p1427_p0 }
  0x88   : > { %s1279_s16 = sand.u32 1, %s1008_s19   ;;  %p1429_p13 = scmp.ne.s32.totalorder %s1417_s25, 0 }
  0x89   : > { %985 = vsyncadd (%p1428_p10), [#allocation5], 4294967264  ;;  %s679_s17 = sshll.u32 %s1279_s16, 2  ;;  %s300_s30 = scalar_lea.sflag [#allocation3], %s1279_s16 }
  0x8a   : > { %s303_s2 = scalar_lea.vmem [#allocation6], %s679_s17 }
  0x8b   : > { %987 = dma.done.wait (%p1429_p13), %s300_s30, 64  }
  0x8c   : > { %989 = vsyncadd (%p1429_p13), %s300_s30, 4294967232  ;;  %s308_s28 = sand.u32 1, %s1162_s15   ;;  %s680_s14 = sshll.u32 %s1279_s16, 3 }
  0x8d   : > { %s309_s29 = scalar_lea.sflag [#allocation8], %s308_s28  ;;  %s312_s11 = scalar_lea.vmem [#allocation7], %s680_s14 }
  0x8e   : > { %991 = dma.done.wait (%p1429_p13), %s309_s29, 640  }
  0x8f   : > { %993 = vsyncadd (%p1429_p13), %s309_s29, 4294966656  ;;  %s681_s7 = sshll.u32 %s1279_s16, 5 }
  0x90   : > { %s1298_s0 = scalar_lea.vmem [#allocation9], %s681_s7 }
  0x91   : > { %326 = sfence }
  0x92   : > { %v368_v0 = vld [vmem:[%s303_s2] sm:$0xf]  ;;  %v380_v1 = vld [vmem:[%s1298_s0 + $0x10] sm:$0xff]  ;;  %v388_v2 = vlaneseq  ;;  %v381_v6 = vld [vmem:[%s1298_s0 + $0x18] sm:$0xff]  ;;  %s1304_s15 = sshll.u32 %s1016_s21, 7  ;;  %s356_s9 = scalar_lea.vmem [#allocation10], %s681_s7 }
  0x93   : > { %v370_v3 = vrot.slane %v368_v0, 6  ;;  %v384_v4 = vmul.f32 0.2, %v380_v1  ;;  %v437_v7 = vld [vmem:[%s312_s11] sm:$0xff]  ;;  %v386_v11 = vmul.f32 0.2, %v381_v6 }
  0x94   : > { %v389_v5 = vshrl.u32 %v388_v2, 7  ;;  %v438_v10 = vrot.slane %v437_v7, 4  ;;  %v378_v15 = vld [vmem:[%s1298_s0] sm:$0xff]  ;;  %v379_v27 = vld [vmem:[%s1298_s0 + $0x8] sm:$0xff]  ;;  %s366_s25 = sadd.s32 1, %s1304_s15  ;;  %s365_s27 = sld [smem:[#allocation2 + %s1304_s15]] }
  0x95   : > { %v372_v8 = vsub.f32 %v368_v0, %v370_v3  ;;  %v385_v9 = vmin.f32 %v384_v4, 4.1351666  ;;  %v387_v17 = vmin.f32 %v386_v11, 4.1351666  ;;  %v382_v21 = vmul.f32 0.1, %v378_v15 }
  0x96   : > { %v439_v14 = vmax.f32 %v437_v7, %v438_v10  ;;  %v390_v16 = vsub.s32 2, %v389_v5  ;;  %v400_v22 = vsub.s32 3, %v389_v5  ;;  %v395_v26 = vsub.s32 0, %v389_v5  ;;  %s367_s6 = sld [smem:[#allocation2 + %s366_s25]]  ;;  %s476_s24 = sshll.u32 %s356_s9, 4  ;;  %s1312_s24 = int_to_ptr.vmem [resolvable:$true] %s476_s24 }
  0x97   : > { %v373_v12 = vmul.f32 0.5, %v372_v8  ;;  %v408_v13 = vmul.f32 1.442695, %v385_v9  ;;  %v412_v20 = vmul.f32 1.442695, %v387_v17  ;;  %v405_v31 = vsub.s32 1, %v389_v5 }
  0x98   : > { %v440_v19 = vrot.slane %v439_v14, 2  ;;  %v391_v25 = vrot.slane %v372_v8, %v390_v16  ;;  %v383_v29 = vmul.f32 0.1, %v379_v27  ;;  %v401_v30 = vrot.slane %v372_v8, %v400_v22  ;;  %s696_s26 = sshll.u32 %s1016_s21, 9  ;;  %s457_s21 = scalar_lea.sflag [#allocation4], %s1279_s16 }
  0x99   : > { %v375_v18 = vrot.slane %v373_v12, 2  ;;  %789 = vpow2.f32 %v408_v13  ;;  %s1317_s17 = scalar_lea.hbm %s1402_s4, %s696_s26  ;;  %s902_s30 = scalar_lea.vmem %s1312_s24, 512 }
  0x9a   : > { %v441_v23 = vmax.f32 %v439_v14, %v440_v19  ;;  %791 = vpow2.f32 %v412_v20  ;;  %v392_v33 = vmul.f32 %v391_v25, %v382_v21  ;;  %v402_v37 = vmul.f32 %v401_v30, %v383_v29  ;;  %p903_p7 = scmp.ne.s32.totalorder %s1312_s24, %s902_s30  ;;  %p1430_p6 = scmp.ne.s32.totalorder %s1419_s10, 0 }
  0x9b   : > { %v377_v24 = vadd.f32 %v375_v18, %v368_v0  ;;  %v423_v55 = vstv %s365_s27  ;;  %s1032_s2 = smov [#allocation10]  }
  0x9c   : > { %v442_v28 = vrot.slane %v441_v23, 1  ;;  %v418_v48 = vstv %s367_s6  ;;  %p904_p1 = pnand %p903_p7, %p1430_p6  ;;  %s906_s28 = sshll.u32 %s1032_s2, 4  ;;  %s907_s28 = int_to_ptr.vmem [resolvable:$false] %s906_s28 }
  0x9d   : > { %v396_v34 = vrot.slane %v377_v24, %v395_v26  ;;  %v406_v38 = vrot.slane %v377_v24, %v405_v31  ;;  %s908_s29 = scalar_lea.vmem %s907_s28, 1024  ;;  %p909_p3 = scmp.lt.s32.totalorder %s1312_s24, %s907_s28 }
  0x9e   : > { %v443_v32 = vmax.f32 %v441_v23, %v442_v28  ;;  %p905_p11 = pneg %p904_p1  ;;  %p910_p8 = scmp.lt.s32.totalorder %s908_s29, %s902_s30 }
  0x9f   : > { %v397_v40 = vadd.f32 %v396_v34, %v392_v33  ;;  %v407_v44 = vadd.f32 %v406_v38, %v402_v37 }
  0xa0   : > { %v444_v35 = vsub.f32 %v437_v7, %v443_v32  ;;  %p911_p2 = por %p910_p8, %p909_p3 }
  0xa2   : > { %v445_v39 = vmul.f32 1.442695, %v444_v35  ;;  %p912_p12 = pnand %p911_p2, %p905_p11 }
  0xa3   : > { %v790_v36 = vpop.eup %789 }
  0xa4   : > { %v410_v41 = vmul.f32 %v790_v36, %v391_v25  ;;  %793 = vpow2.f32 %v445_v39  ;;  %v792_v42 = vpop.eup %791 }
  0xa5   : > { %v414_v45 = vmul.f32 %v792_v42, %v401_v30 }
  0xa6   : > { %v411_v43 = vmul.f32 0.5, %v410_v41 }
  0xa7   : > { %v415_v49 = vmul.f32 0.5, %v414_v45 }
  0xa8   : > { %v416_v46 = vsub.f32 %v397_v40, %v411_v43  ;;  %v427_v47 = vadd.f32 %v411_v43, %v397_v40 }
  0xa9   : > { %v421_v52 = vsub.f32 %v407_v44, %v415_v49  ;;  %v432_v53 = vadd.f32 %v415_v49, %v407_v44 }
  0xaa   : > { %v417_v50 = vmax.f32 %v416_v46, 0.0  ;;  %v428_v51 = vmax.f32 %v427_v47, 0.0 }
  0xab   : > { %v422_v57 = vmax.f32 %v421_v52, 0.0  ;;  %v433_v58 = vmax.f32 %v432_v53, 0.0 }
  0xac   : > { %v419_v54 = vmin.f32 %v418_v48, %v417_v50  ;;  %v429_v56 = vmin.f32 %v418_v48, %v428_v51 }
  0xad   : > { %v424_v60 = vmin.f32 %v423_v55, %v422_v57  ;;  %v434_v61 = vmin.f32 %v423_v55, %v433_v58 }
  0xae   : > { %420 = vst [vmem:[%s356_s9] sm:$0xff] %v419_v54  ;;  %686 = vst [vmem:[%s356_s9 + $0x10] sm:$0xff] %v429_v56  ;;  %v794_v59 = vpop.eup %793 }
  0xaf   : > { %v447_v62 = vrot.slane %v794_v59, 4  ;;  %685 = vst [vmem:[%s356_s9 + $0x8] sm:$0xff] %v424_v60  ;;  %687 = vst [vmem:[%s356_s9 + $0x18] sm:$0xff] %v434_v61 }
  0xb1   : > { %v448_v63 = vadd.f32 %v794_v59, %v447_v62 }
  0xb2   : > { %915 = shalt.err (!%p912_p12)
}
  0xb3   : > { %s916_s11 = scalar_lea.hbm %s1317_s17, 512  ;;  %s920_s25 = scalar_lea.hbm %s1402_s4, 1024 }
  0xb4   : > { %p917_p4 = scmp.ne.s32.totalorder %s1317_s17, %s916_s11  ;;  %p921_p0 = scmp.lt.u32.totalorder %s1317_s17, %s1402_s4 }
  0xb5   : > { %p922_p10 = scmp.lt.u32.totalorder %s920_s25, %s916_s11  ;;  %p924_p7 = scmp.lt.u32.totalorder %s916_s11, %s1317_s17 }
  0xb6   : > { %p918_p5 = pnand %p917_p4, %p1430_p6 }
  0xb7   : > { %p923_p13 = por %p922_p10, %p921_p0 }
  0xb8   : > { %p919_p9 = pneg %p918_p5 }
  0xb9   : > { %p925_p1 = por %p924_p7, %p923_p13 }
  0xbb   : > { %p926_p11 = pnand %p925_p1, %p919_p9 }
  0xbd   : > { %929 = shalt.err (!%p926_p11)
}
  0xbe   : > { %s1033_s9 = smov 128   ;;  %s1034_s26 = smov 8   ;;  %v449_v0 = vrot.slane %v448_v63, 2 }
  0xbf   : > { %707 = dma.vmem_to_hbm [thread:$0]  (%p1430_p6), %s1312_s24, 512, %s1317_s17, %s457_s21, %s1033_s9, %s1033_s9, %s1034_s26  }
  0xc0   : > { %v450_v1 = vadd.f32 %v449_v0, %v448_v63  ;;  %s363_s13 = scalar_lea.vmem [#allocation11], %s680_s14  ;;  %s1349_s28 = scalar_lea.hbm %s1403_s5, %s1304_s15 }
  0xc1   : > { %s493_s8 = sshll.u32 %s363_s13, 4  ;;  %s462_s24 = scalar_lea.sflag [#allocation12], %s1279_s16  ;;  %s1351_s8 = int_to_ptr.vmem [resolvable:$true] %s493_s8 }
  0xc2   : > { %v451_v2 = vrot.slane %v450_v1, 1  ;;  %s930_s17 = scalar_lea.vmem %s1351_s8, 128  ;;  %s1035_s14 = smov [#allocation11]  }
  0xc3   : > { %p931_p3 = scmp.ne.s32.totalorder %s1351_s8, %s930_s17  ;;  %s934_s21 = sshll.u32 %s1035_s14, 4  ;;  %s935_s21 = int_to_ptr.vmem [resolvable:$false] %s934_s21 }
  0xc4   : > { %v452_v3 = vadd.f32 %v451_v2, %v450_v1  ;;  %s936_s29 = scalar_lea.vmem %s935_s21, 256  ;;  %p937_p12 = scmp.lt.s32.totalorder %s1351_s8, %s935_s21 }
  0xc5   : > { %p932_p8 = pnand %p931_p3, %p1430_p6  ;;  %p938_p4 = scmp.lt.s32.totalorder %s936_s29, %s930_s17 }
  0xc6   : > { %795 = vrcp.f32 %v452_v3 }
  0xc7   : > { %p933_p2 = pneg %p932_p8  ;;  %p939_p5 = por %p938_p4, %p937_p12 }
  0xc9   : > { %p940_p9 = pnand %p939_p5, %p933_p2 }
  0xd0   : > { %v796_v4 = vpop.eup %795 }
  0xd1   : > { %v454_v5 = vmul.f32 %v796_v4, %v794_v59 }
  0xd3   : > { %455 = vst [vmem:[%s363_s13] sm:$0xff] %v454_v5 }
  0xd4   : > { %943 = shalt.err (!%p940_p9)
}
  0xd5   : > { %s944_s16 = scalar_lea.hbm %s1349_s28, 128  ;;  %s948_s7 = scalar_lea.hbm %s1403_s5, 256 }
  0xd6   : > { %p945_p0 = scmp.ne.s32.totalorder %s1349_s28, %s944_s16  ;;  %p949_p7 = scmp.lt.u32.totalorder %s1349_s28, %s1403_s5 }
  0xd7   : > { %p950_p1 = scmp.lt.u32.totalorder %s948_s7, %s944_s16  ;;  %p952_p3 = scmp.lt.u32.totalorder %s944_s16, %s1349_s28 }
  0xd8   : > { %p946_p10 = pnand %p945_p0, %p1430_p6 }
  0xd9   : > { %p951_p11 = por %p950_p1, %p949_p7 }
  0xda   : > { %p947_p13 = pneg %p946_p10 }
  0xdb   : > { %p953_p8 = por %p952_p3, %p951_p11 }
  0xdd   : > { %p954_p2 = pnand %p953_p8, %p947_p13 }
  0xdf   : > { %957 = shalt.err (!%p954_p2)
}
  0xe0   : > { %708 = dma.vmem_to_hbm [thread:$0]  (%p1430_p6), %s1351_s8, 128, %s1349_s28, %s462_s24  }
  0xe1 PF: > { %s505_s6 = sand.u32 1, %s1004_s18   ;;  %p1431_p12 = scmp.ne.s32.totalorder %s1420_s12, 0 }
  0xe2   : > { %p1432_p4 = scmp.ge.s32.totalorder %s1024_s23, 2  ;;  %s506_s27 = scalar_lea.sflag [#allocation4], %s505_s6 }
  0xe4   : > { %p726_p5 = pnand %p1432_p4, %p1431_p12 }
  0xe6   : > { %995 = dma.done.wait (!%p726_p5), %s506_s27, 512  }
  0xe7   : > { %997 = vsyncadd (!%p726_p5), %s506_s27, 4294966784  ;;  %s515_s9 = scalar_lea.sflag [#allocation12], %s505_s6 }
  0xe8   : > { %999 = dma.done.wait (!%p726_p5), %s515_s9, 128  }
  0xe9   : > { %1001 = vsyncadd (!%p726_p5), %s515_s9, 4294967168  ;;  %s29_s23 = sadd.s32 1, %s1024_s23   ;;  %s1433_s10 = sld [smem:[#allocation19_spill]] }
  0xea   : > { %p26_p9 = scmp.ge.s32.totalorder %s29_s23, 4   ;;  %s1434_s26 = sld [smem:[#allocation18_spill]] }
  0xeb   : > { %s1435_s18 = smov %s1008_s19  ;;  %s1436_s19 = smov %s1012_s20 }
  0xec   : > { %s1438_s21 = smov %s1020_s22  ;;  %28 = sbr.rel (!%p26_p9) target bundleno = 14 (0xe), region = 130 }
  0xef   : > { %s1437_s20 = smov %s1433_s10 }
  0xf0   : > { %s1439_s22 = smov %s1434_s26 }
  0xf3   :  { %520 = vsyncpa [#allocation3], 1 }
  0xf4   :  { %522 = vsyncpa [#allocation3 + $0x1], 1 }
  0xf5   :  { %523 = vsyncpa [#allocation8], 1 }
  0xf6   :  { %525 = vsyncpa [#allocation8 + $0x1], 1 }
  0xf7   :  { %526 = vsyncpa [#allocation4], 1 }
  0xf8   :  { %528 = vsyncpa [#allocation4 + $0x1], 1 }
  0xf9   :  { %529 = vsyncpa [#allocation12], 1 }
  0xfa   :  { %531 = vsyncpa [#allocation12 + $0x1], 1 }
  0xfb   :  { %532 = vsyncpa [#allocation5], 1 }
  0xfc   :  { %534 = vsyncpa [#allocation5 + $0x1], 1 }

</bundles_post_ra>
